<compile_context>
chip_gen: v7x
topology: tpu7x:2x2x1
jax: 0.10.0
libtpu: 0.0.40
codegen_flags: <defaults>
</compile_context>

<pallas_src>
import jax
import jax.numpy as jnp
from jax.experimental import pallas as pl
from jax.experimental.pallas import tpu as pltpu


_LANES = 128
_HIDDEN = 64
_TOTAL_VMEM_BUDGET = 26 * 1024 * 1024    # target resident VMEM (all buffers)
_VMEM_LIMIT_BYTES = 32 * 1024 * 1024     # explicit scoped-VMEM limit


def _round_up(x, m):
    return ((x + m - 1) // m) * m


def _make_kernel(T, tt, mask_tokens):
    """Kernel closure over the static token extent / tile size."""

    def kernel(x_ref, w2_ref, b2_ref, w3_ref, b3_ref, o_ref, pooled_acc):
        t = pl.program_id(1)

        @pl.when(t == 0)
        def _():
            pooled_acc[...] = jnp.full_like(pooled_acc, -jnp.inf)

        x = x_ref[...]
        if mask_tokens:
            # Ragged final token tile: neutralize out-of-range tokens for the
            # max-pool (compile-time T, no scalar prefetch needed).
            tok = jax.lax.broadcasted_iota(jnp.int32, (tt, x.shape[-1]), 0)
            valid = (tok + t * tt) < T
            x = jnp.where(valid[None, :, :], x, jnp.array(-jnp.inf, x.dtype))

        # Reduce in the input dtype; cast only the (tb, D) partial result.
        part = jnp.max(x, axis=1).astype(jnp.float32)
        pooled_acc[...] = jnp.maximum(pooled_acc[...], part)

        @pl.when(t == pl.num_programs(1) - 1)
        def _():
            # fc2 + ReLU.  Dropout(p=0.3) is the identity at inference time.
            # TODO(synk): training-mode dropout would need pltpu.prng_seed +
            # pltpu.prng_random_bits masking; only eval semantics implemented.
            h = jnp.dot(pooled_acc[...], w2_ref[...],
                        preferred_element_type=jnp.float32) + b2_ref[...]
            h = jnp.maximum(h, 0.0)
            # fc3 against a lane-padded (64, 128) RHS -> lane-dense store.
            out = jnp.dot(h, w3_ref[...],
                          preferred_element_type=jnp.float32) + b3_ref[...]
            o_ref[...] = out.astype(o_ref.dtype)

    return kernel


def prepare_params(w2, b2, w3, b3):
    """One-time parameter prep (transpose + lane padding), hoisted out of the
    per-call path."""
    H, D = w2.shape            # (64, input_dim)
    C = w3.shape[0]            # 3
    cp = _LANES                # pad the fc3 output width to a full lane dim
    w2_t = jnp.transpose(w2).astype(jnp.float32)                     # (D, 64)
    b2_2d = b2.reshape(1, H).astype(jnp.float32)                     # (1, 64)
    w3_pad = jnp.zeros((H, cp), jnp.float32).at[:, :C].set(
        jnp.transpose(w3).astype(jnp.float32))                       # (64, 128)
    b3_pad = jnp.zeros((1, cp), jnp.float32).at[:, :C].set(
        b3.astype(jnp.float32))                                      # (1, 128)
    return dict(w2_t=w2_t, b2=b2_2d, w3_pad=w3_pad, b3_pad=b3_pad,
                input_dim=D, hidden=H, num_classes=C)


def _choose_tiles(B, T, D, x_elem_bytes, nbuf=3,
                  total_budget=_TOTAL_VMEM_BUDGET):
    """Pick (tb, tt, n_batch_tiles).

    Budget covers everything resident in VMEM: `nbuf` x tiles, the f32 pooled
    accumulator, the double-buffered f32 output tile, and the (double
    buffered) f32 weights/biases.
    """
    H, CP = _HIDDEN, _LANES
    fixed = 2 * 4 * (D * H + H + H * CP + CP)        # weights + biases, x2 bufs
    avail = max(total_budget - fixed, 1 << 20)

    def per_row_bytes(tt):
        return nbuf * tt * D * x_elem_bytes + D * 4 + 2 * CP * 4

    rows_min = min(B, 8)
    if rows_min * per_row_bytes(T) <= avail:
        tt = T                                       # whole token axis per tile
    else:
        tt_fit = (avail // rows_min - D * 4 - 2 * CP * 4) // (nbuf * D * x_elem_bytes)
        tt = max(8, (tt_fit // 8) * 8)
        tt = min(tt, T)

    tb_cap = max(8, (avail // per_row_bytes(tt) // 8) * 8)

    if B <= 8 or (B < 16 and B <= tb_cap):
        # Single tile covering the whole (small) batch; block dim == full dim.
        tb, n_b = B, 1
    else:
        # >= 2 balanced tiles so the "parallel" axis shards across v7x's 2 TCs.
        n_b = max(pl.cdiv(B, tb_cap), 2)
        tb = _round_up(pl.cdiv(B, n_b), 8)
        n_b = pl.cdiv(B, tb)
    return tb, tt, n_b


def _build_call(kernel, B_out, tb, tt, n_b, n_t, D, H, CP, use_buffered):
    x_spec_kwargs = {}
    if use_buffered:
        x_spec_kwargs = dict(pipeline_mode=pl.Buffered(3))   # deeper DMA pipeline
    in_specs = [
        pl.BlockSpec((tb, tt, D), lambda b, t: (b, t, 0), **x_spec_kwargs),  # x
        pl.BlockSpec((D, H), lambda b, t: (0, 0)),            # w2^T
        pl.BlockSpec((1, H), lambda b, t: (0, 0)),            # b2
        pl.BlockSpec((H, CP), lambda b, t: (0, 0)),           # w3^T (lane-padded)
        pl.BlockSpec((1, CP), lambda b, t: (0, 0)),           # b3 (lane-padded)
    ]
    return pl.pallas_call(
        kernel,
        out_shape=jax.ShapeDtypeStruct((B_out, CP), jnp.float32),
        grid_spec=pltpu.PrefetchScalarGridSpec(
            num_scalar_prefetch=0,
            grid=(n_b, n_t),
            in_specs=in_specs,
            # Output block constant along the token axis -> resident target,
            # written once in the pl.when epilogue (lane-dense 128-wide store).
            out_specs=pl.BlockSpec((tb, CP), lambda b, t: (b, 0)),
            scratch_shapes=[pltpu.VMEM((tb, D), jnp.float32)],   # running max
        ),
        compiler_params=pltpu.CompilerParams(
            dimension_semantics=("parallel", "arbitrary"),
            vmem_limit_bytes=_VMEM_LIMIT_BYTES),
    )


def sentiment_layer5(x, params):
    """x: (B, T, D) f32 or bf16; params from prepare_params(). Returns f32 (B, 3)."""
    B, T, D = x.shape
    assert D == params["input_dim"], (D, params["input_dim"])
    H = params["hidden"]
    C = params["num_classes"]
    CP = params["w3_pad"].shape[1]

    eb = jnp.dtype(x.dtype).itemsize
    tb, tt, n_b = _choose_tiles(B, T, D, eb)
    n_t = pl.cdiv(T, tt)
    mask_tokens = (T % tt) != 0
    kernel = _make_kernel(T, tt, mask_tokens)
    B_out = n_b * tb                       # output allocated tile-aligned; sliced below

    args = (x, params["w2_t"], params["b2"], params["w3_pad"], params["b3_pad"])

    total_steps = n_b * n_t
    use_buffered = hasattr(pl, "Buffered") and total_steps >= 3
    if use_buffered:
        try:
            out = _build_call(kernel, B_out, tb, tt, n_b, n_t, D, H, CP,
                              use_buffered=True)(*args)
            return out[:B, :C]
        except Exception:
            pass   # fall back to default double buffering
    out = _build_call(kernel, B_out, tb, tt, n_b, n_t, D, H, CP,
                      use_buffered=False)(*args)
    return out[:B, :C]


def _reference(x, w2, b2, w3, b3):
    pooled = jnp.max(x, axis=1)
    h = jnp.maximum(pooled @ w2.T + b2, 0.0)
    return h @ w3.T + b3


if __name__ == "__main__":
    # Small shapes consistent with the module: batch=2, seq=8, input_dim=32.
    B, T, D = 2, 8, 32
    H, C = 64, 3

    key = jax.random.PRNGKey(0)
    kx, kw2, kb2, kw3, kb3 = jax.random.split(key, 5)

    x = jax.random.normal(kx, (B, T, D), dtype=jnp.float32)

    # Deterministic parameter init (PyTorch-Linear-style uniform bounds).
    bound2 = 1.0 / (D ** 0.5)
    w2 = jax.random.uniform(kw2, (H, D), jnp.float32, -bound2, bound2)
    b2 = jax.random.uniform(kb2, (H,), jnp.float32, -bound2, bound2)
    bound3 = 1.0 / (H ** 0.5)
    w3 = jax.random.uniform(kw3, (C, H), jnp.float32, -bound3, bound3)
    b3 = jax.random.uniform(kb3, (C,), jnp.float32, -bound3, bound3)

    params = prepare_params(w2, b2, w3, b3)     # one-time prep (hoisted)

    out = sentiment_layer5(x, params)
    out = jax.block_until_ready(out)

    ref = _reference(x, w2, b2, w3, b3)
    assert out.shape == (B, C), out.shape
    assert jnp.allclose(out, ref, atol=1e-5, rtol=1e-5), (out, ref)

    print("KERNEL_OK")
</pallas_src>

<mosaic_0001>
module attributes {stable_mosaic.version = 11 : i64} {
  func.func @kernel(%arg0: i32, %arg1: i32, %arg2: memref<2x8x32xf32, #tpu.memory_space<vmem>>, %arg3: memref<32x64xf32, #tpu.memory_space<vmem>>, %arg4: memref<1x64xf32, #tpu.memory_space<vmem>>, %arg5: memref<64x128xf32, #tpu.memory_space<vmem>>, %arg6: memref<1x128xf32, #tpu.memory_space<vmem>>, %arg7: memref<2x128xf32, #tpu.memory_space<vmem>>, %arg8: memref<2x32xf32, #tpu.memory_space<vmem>>) attributes {dimension_semantics = [#tpu.dimension_semantics<parallel>, #tpu.dimension_semantics<arbitrary>], iteration_bounds = array<i64: 1, 1>, scalar_prefetch = 0 : i64, scratch_operands = 1 : i64, tpu.core_type = #tpu.core_type<tc>, window_params = [{transform_indices = @transform_0, window_bounds = array<i64: 2, 8, 32>}, {pipeline_mode = #tpu.pipeline_mode<synchronous>, transform_indices = @transform_1, window_bounds = array<i64: 32, 64>}, {pipeline_mode = #tpu.pipeline_mode<synchronous>, transform_indices = @transform_2, window_bounds = array<i64: 1, 64>}, {pipeline_mode = #tpu.pipeline_mode<synchronous>, transform_indices = @transform_3, window_bounds = array<i64: 64, 128>}, {pipeline_mode = #tpu.pipeline_mode<synchronous>, transform_indices = @transform_4, window_bounds = array<i64: 1, 128>}, {transform_indices = @transform_5, window_bounds = array<i64: 2, 128>}]} {
    %c0_i32 = arith.constant 0 : i32
    %0 = arith.cmpi eq, %arg1, %c0_i32 : i32
    %1 = arith.extui %0 : i1 to i32
    %c0_i32_0 = arith.constant 0 : i32
    %2 = arith.cmpi ne, %1, %c0_i32_0 : i32
    scf.if %2 {
      %cst_9 = arith.constant 0xFF800000 : f32
      %11 = vector.broadcast %cst_9 : f32 to vector<2x32xf32>
      %c0_10 = arith.constant 0 : index
      %c0_11 = arith.constant 0 : index
      %12 = vector.load %arg8[%c0_10, %c0_11] : memref<2x32xf32, #tpu.memory_space<vmem>>, vector<2x32xf32>
      tpu.vector_store %arg8[%c0_10, %c0_11], %11 {strides = array<i32>} : memref<2x32xf32, #tpu.memory_space<vmem>>, vector<2x32xf32>,
    } else {
    }
    %c0 = arith.constant 0 : index
    %c0_1 = arith.constant 0 : index
    %c0_2 = arith.constant 0 : index
    %3 = vector.load %arg2[%c0, %c0_1, %c0_2] : memref<2x8x32xf32, #tpu.memory_space<vmem>>, vector<2x8x32xf32>
    %cst = arith.constant dense<0xFF800000> : vector<2x32xf32>
    %4 = vector.multi_reduction <maximumf>, %3, %cst [1] : vector<2x8x32xf32> to vector<2x32xf32>
    %c0_3 = arith.constant 0 : index
    %c0_4 = arith.constant 0 : index
    %5 = vector.load %arg8[%c0_3, %c0_4] : memref<2x32xf32, #tpu.memory_space<vmem>>, vector<2x32xf32>
    %6 = arith.maximumf %5, %4 : vector<2x32xf32>
    %c0_5 = arith.constant 0 : index
    %c0_6 = arith.constant 0 : index
    %7 = vector.load %arg8[%c0_5, %c0_6] : memref<2x32xf32, #tpu.memory_space<vmem>>, vector<2x32xf32>
    tpu.vector_store %arg8[%c0_5, %c0_6], %6 {strides = array<i32>} : memref<2x32xf32, #tpu.memory_space<vmem>>, vector<2x32xf32>,
    %c0_i32_7 = arith.constant 0 : i32
    %8 = arith.cmpi eq, %arg1, %c0_i32_7 : i32
    %9 = arith.extui %8 : i1 to i32
    %c0_i32_8 = arith.constant 0 : i32
    %10 = arith.cmpi ne, %9, %c0_i32_8 : i32
    scf.if %10 {
      %c0_9 = arith.constant 0 : index
      %c0_10 = arith.constant 0 : index
      %11 = vector.load %arg8[%c0_9, %c0_10] : memref<2x32xf32, #tpu.memory_space<vmem>>, vector<2x32xf32>
      %c0_11 = arith.constant 0 : index
      %c0_12 = arith.constant 0 : index
      %12 = vector.load %arg3[%c0_11, %c0_12] : memref<32x64xf32, #tpu.memory_space<vmem>>, vector<32x64xf32>
      %cst_13 = arith.constant dense<0.000000e+00> : vector<2x64xf32>
      %13 = tpu.matmul %11, %12, %cst_13 {dimension_numbers = #tpu.dot_dimension_numbers<[1], [0], [0], [1], [0, 0, 1, 1], [], []>} : vector<2x32xf32>, vector<32x64xf32>, vector<2x64xf32> -> vector<2x64xf32>
      %c0_14 = arith.constant 0 : index
      %c0_15 = arith.constant 0 : index
      %14 = vector.load %arg4[%c0_14, %c0_15] : memref<1x64xf32, #tpu.memory_space<vmem>>, vector<1x64xf32>
      %15 = vector.broadcast %14 : vector<1x64xf32> to vector<2x64xf32>
      %16 = arith.addf %13, %15 : vector<2x64xf32>
      %cst_16 = arith.constant 0.000000e+00 : f32
      %17 = vector.broadcast %cst_16 : f32 to vector<2x64xf32>
      %18 = arith.maximumf %16, %17 : vector<2x64xf32>
      %c0_17 = arith.constant 0 : index
      %c0_18 = arith.constant 0 : index
      %19 = vector.load %arg5[%c0_17, %c0_18] : memref<64x128xf32, #tpu.memory_space<vmem>>, vector<64x128xf32>
      %cst_19 = arith.constant dense<0.000000e+00> : vector<2x128xf32>
      %20 = tpu.matmul %18, %19, %cst_19 {dimension_numbers = #tpu.dot_dimension_numbers<[1], [0], [0], [1], [0, 0, 1, 1], [], []>} : vector<2x64xf32>, vector<64x128xf32>, vector<2x128xf32> -> vector<2x128xf32>
      %c0_20 = arith.constant 0 : index
      %c0_21 = arith.constant 0 : index
      %21 = vector.load %arg6[%c0_20, %c0_21] : memref<1x128xf32, #tpu.memory_space<vmem>>, vector<1x128xf32>
      %22 = vector.broadcast %21 : vector<1x128xf32> to vector<2x128xf32>
      %23 = arith.addf %20, %22 : vector<2x128xf32>
      %c0_22 = arith.constant 0 : index
      %c0_23 = arith.constant 0 : index
      %24 = vector.load %arg7[%c0_22, %c0_23] : memref<2x128xf32, #tpu.memory_space<vmem>>, vector<2x128xf32>
      tpu.vector_store %arg7[%c0_22, %c0_23], %23 {strides = array<i32>} : memref<2x128xf32, #tpu.memory_space<vmem>>, vector<2x128xf32>,
    } else {
    }
    return
  }
  func.func @transform_0(%arg0: i32, %arg1: i32) -> (i32, i32, i32) {
    %c0_i32 = arith.constant 0 : i32
    %c0_i32_0 = arith.constant 0 : i32
    return %arg0, %arg1, %c0_i32 : i32, i32, i32
  }
  func.func @transform_1(%arg0: i32, %arg1: i32) -> (i32, i32) {
    %c0_i32 = arith.constant 0 : i32
    %c0_i32_0 = arith.constant 0 : i32
    %c0_i32_1 = arith.constant 0 : i32
    return %c0_i32, %c0_i32_0 : i32, i32
  }
  func.func @transform_2(%arg0: i32, %arg1: i32) -> (i32, i32) {
    %c0_i32 = arith.constant 0 : i32
    %c0_i32_0 = arith.constant 0 : i32
    %c0_i32_1 = arith.constant 0 : i32
    return %c0_i32, %c0_i32_0 : i32, i32
  }
  func.func @transform_3(%arg0: i32, %arg1: i32) -> (i32, i32) {
    %c0_i32 = arith.constant 0 : i32
    %c0_i32_0 = arith.constant 0 : i32
    %c0_i32_1 = arith.constant 0 : i32
    return %c0_i32, %c0_i32_0 : i32, i32
  }
  func.func @transform_4(%arg0: i32, %arg1: i32) -> (i32, i32) {
    %c0_i32 = arith.constant 0 : i32
    %c0_i32_0 = arith.constant 0 : i32
    %c0_i32_1 = arith.constant 0 : i32
    return %c0_i32, %c0_i32_0 : i32, i32
  }
  func.func @transform_5(%arg0: i32, %arg1: i32) -> (i32, i32) {
    %c0_i32 = arith.constant 0 : i32
    %c0_i32_0 = arith.constant 0 : i32
    return %arg0, %c0_i32 : i32, i32
  }
}

</mosaic_0001>

<bundles_post_ra>
// kernel: tpu_custom_call.1
= control target key start
LH: loop header
LB: loop body
LE: loop exit
PB: predicated region body
PF: predicated region fallthrough
CT: control target
= control target key end

     0   :  { %10 = vsyncpa [#allocation4], 0  ;;  %s574_s0 = inlined_call_operand.hbm [shape: f32[2,8,32], index: 0, kind: input, shape index: {}]   ;;  %s575_s1 = inlined_call_operand.hbm [shape: f32[32,64], index: 1, kind: input, shape index: {}]   ;;  %s576_s2 = inlined_call_operand.vmem [shape: f32[1,64], index: 2, kind: input, shape index: {}]   ;;  %s577_s3 = inlined_call_operand.hbm [shape: f32[64,128], index: 3, kind: input, shape index: {}]   ;;  %s578_s4 = inlined_call_operand.vmem [shape: f32[1,128], index: 4, kind: input, shape index: {}]   ;;  %s579_s5 = inlined_call_operand.hbm [shape: f32[2,128], index: 5, kind: output, shape index: {}]  }
   0x1   :  { %11 = vsyncpa [#allocation7], 0 }
   0x2   :  { %12 = vsyncpa [#allocation5], 0  ;;  %s459_s18 = smov [#allocation6]   ;;  %s460_s20 = smov [#allocation3]  }
   0x3   :  { %s30_s19 = sshll.u32 %s459_s18, 4  ;;  %s18_s21 = sshll.u32 %s460_s20, 4  ;;  %s31_s19 = int_to_ptr.vmem [resolvable:$true] %s30_s19  ;;  %s499_s21 = int_to_ptr.vmem [resolvable:$true] %s18_s21 }
   0x4   :  { %s365_s24 = scalar_lea.hbm %s575_s1, 512 }
   0x5   :  { %p366_p0 = scmp.ne.s32.totalorder %s575_s1, %s365_s24  ;;  %p369_p1 = scmp.lt.u32.totalorder %s365_s24, %s575_s1 }
   0x7   :  { %p371_p2 = pnand %p369_p1, %p366_p0 }
   0x9   :  { %374 = shalt.err (!%p371_p2)
}
   0xa   :  { %s375_s29 = scalar_lea.vmem %s31_s19, 512  ;;  %p380_p4 = scmp.lt.s32.totalorder %s31_s19, %s31_s19 }
   0xb   :  { %p376_p3 = scmp.ne.s32.totalorder %s31_s19, %s375_s29  ;;  %p381_p5 = scmp.lt.s32.totalorder %s375_s29, %s375_s29 }
   0xd   :  { %p382_p6 = por %p381_p5, %p380_p4 }
   0xf   :  { %p383_p7 = pnand %p382_p6, %p376_p3 }
  0x11   :  { %386 = shalt.err (!%p383_p7)
}
  0x12   :  { %s461_s30 = smov 128   ;;  %s462_s6 = smov 8  }
  0x13   :  { %36 = dma.hbm_to_vmem [thread:$0]  %s575_s1, 512, %s31_s19, [#allocation7], %s461_s30, %s461_s30, %s462_s6  }
  0x14   :  { %s387_s11 = scalar_lea.hbm %s574_s0, 256 }
  0x15   :  { %p388_p8 = scmp.ne.s32.totalorder %s574_s0, %s387_s11  ;;  %p391_p9 = scmp.lt.u32.totalorder %s387_s11, %s574_s0 }
  0x17   :  { %p393_p10 = pnand %p391_p9, %p388_p8 }
  0x19   :  { %396 = shalt.err (!%p393_p10)
}
  0x1a   :  { %s397_s16 = scalar_lea.vmem %s499_s21, 256  ;;  %p402_p12 = scmp.lt.s32.totalorder %s499_s21, %s499_s21 }
  0x1b   :  { %p398_p11 = scmp.ne.s32.totalorder %s499_s21, %s397_s16  ;;  %p403_p13 = scmp.lt.s32.totalorder %s397_s16, %s397_s16 }
  0x1d   :  { %p404_p0 = por %p403_p13, %p402_p12 }
  0x1f   :  { %p405_p1 = pnand %p404_p0, %p398_p11 }
  0x21   :  { %408 = shalt.err (!%p405_p1)
}
  0x22   :  { %24 = dma.hbm_to_vmem [thread:$0]  %s574_s0, 256, %s499_s21, [#allocation4], %s461_s30, %s461_s30, %s462_s6  }
  0x23   :  { %s463_s18 = smov [#allocation8]   ;;  %s409_s23 = scalar_lea.hbm %s577_s3, 1024 }
  0x24   :  { %s44_s19 = sshll.u32 %s463_s18, 4  ;;  %p410_p2 = scmp.ne.s32.totalorder %s577_s3, %s409_s23  ;;  %s45_s19 = int_to_ptr.vmem [resolvable:$true] %s44_s19 }
  0x25   :  { %p413_p3 = scmp.lt.u32.totalorder %s409_s23, %s577_s3 }
  0x27   :  { %p415_p4 = pnand %p413_p3, %p410_p2 }
  0x29   :  { %418 = shalt.err (!%p415_p4)
}
  0x2a   :  { %s419_s28 = scalar_lea.vmem %s45_s19, 1024  ;;  %p424_p6 = scmp.lt.s32.totalorder %s45_s19, %s45_s19 }
  0x2b   :  { %p420_p5 = scmp.ne.s32.totalorder %s45_s19, %s419_s28  ;;  %p425_p7 = scmp.lt.s32.totalorder %s419_s28, %s419_s28 }
  0x2d   :  { %p426_p8 = por %p425_p7, %p424_p6 }
  0x2f   :  { %p427_p9 = pnand %p426_p8, %p420_p5 }
  0x31   :  { %430 = shalt.err (!%p427_p9)
}
  0x32   :  { %50 = dma.hbm_to_vmem [thread:$0]  %s577_s3, 1024, %s45_s19, [#allocation7], %s461_s30, %s461_s30, %s462_s6  }
  0x33   :  { %453 = dma.done.wait [#allocation4], 256  }
  0x34   :  { %454 = vsyncadd [#allocation4], 4294967040 }
  0x35   :  { %455 = dma.done.wait [#allocation7], 1536  }
  0x36   :  { %456 = vsyncadd [#allocation7], 4294965760  ;;  %vm66_vm0 = vcmask 254976   ;;  %v464_v0 = vmov 0.0|0.0   ;;  %vm465_vm1 = vmmov 0   ;;  %v466_v1 = vmov 0.0  }
  0x37   :  { %337 = vmatprep.subr.bf16.mxu0 %v464_v0  ;;  %315 = vmatprep.mubr.msk.f32.mxu0 %vm465_vm1, %v466_v1  ;;  %v467_v2 = vmov -inf   ;;  %vm70_vm2 = vcmask 261120   ;;  %v98_v3 = vld [vmem:[#allocation6] sm:$0xff]  ;;  %v99_v4 = vld [vmem:[#allocation6 + $0x8] sm:$0xff]  ;;  %v100_v5 = vld [vmem:[#allocation6 + $0x10] sm:$0xff]  ;;  %vm88_vm3 = vcmask 1041409  }
  0x38   :  { %67 = vst.msk [vmem:[#allocation2] sm:$0x3] %vm66_vm0, %v467_v2  ;;  %343 = vmatprep.subr.bf16.mxu1 %v464_v0  ;;  %334 = vmatprep.mubr.msk.f32.mxu1 %vm465_vm1, %v466_v1  ;;  %v338_v6 = vpack.c.bf16 %v99_v4, %v98_v3  ;;  %v101_v7 = vld [vmem:[#allocation6 + $0x18] sm:$0xff]  ;;  %v68_v8 = vld [vmem:[#allocation3] sm:$0xff]  ;;  %v183_v12 = vld [vmem:[#allocation8] sm:$0xff]  ;;  %vm198_vm4 = vcmask 523264  }
  0x39   :  { %v69_v9 = vld [vmem:[#allocation3 + $0x8] sm:$0xff]  ;;  %v71_v10 = vsel %vm70_vm2, %v68_v8, -inf  ;;  %v184_v13 = vld [vmem:[#allocation8 + $0x8] sm:$0xff]  ;;  %v341_v14 = vpack.c.bf16 %v101_v7, %v100_v5  ;;  %v185_v18 = vld [vmem:[#allocation8 + $0x10] sm:$0xff]  ;;  %s468_s7 = smov [#allocation9]  }
  0x3a   :  { %v78_v11 = vsel %vm70_vm2, %v69_v9, -inf  ;;  %339 = vmatpush3.bf16.msra.mxu0 %v338_v6  ;;  %v72_v15 = vrot.slane %v71_v10, 4  ;;  %v344_v17 = vpack.c.bf16 %v184_v13, %v183_v12  ;;  %v186_v19 = vld [vmem:[#allocation8 + $0x18] sm:$0xff]  ;;  %v187_v23 = vld [vmem:[#allocation8 + $0x20] sm:$0xff]  ;;  %v188_v24 = vld [vmem:[#allocation8 + $0x28] sm:$0xff]  ;;  %s279_s8 = sshll.u32 %s468_s7, 4  ;;  %s280_s8 = int_to_ptr.vmem [resolvable:$true] %s279_s8 }
  0x3b   :  { %v79_v16 = vrot.slane %v78_v11, 4  ;;  %340 = vmatprep.subr.bf16.mxu0 %v464_v0  ;;  %v347_v22 = vpack.c.bf16 %v186_v19, %v185_v18  ;;  %v350_v29 = vpack.c.bf16 %v188_v24, %v187_v23  ;;  %v189_v38 = vld [vmem:[#allocation8 + $0x30] sm:$0xff]  ;;  %v190_v39 = vld [vmem:[#allocation8 + $0x38] sm:$0xff]  ;;  %v289_v41 = vld [vmem:[%s576_s2] ss:$0 sm:$0xff]  ;;  %s431_s9 = scalar_lea.vmem %s280_s8, 32  ;;  %p436_p11 = scmp.lt.s32.totalorder %s280_s8, %s280_s8 }
  0x3c   :  { %v73_v20 = vmax.f32 %v71_v10, %v72_v15  ;;  %345 = vmatpush3.bf16.msra.mxu1 %v344_v17  ;;  %v353_v40 = vpack.c.bf16 %v190_v39, %v189_v38  ;;  %v291_v46 = vld [vmem:[%s578_s4] ss:$0 sm:$0xff]  ;;  %p432_p10 = scmp.ne.s32.totalorder %s280_s8, %s431_s9  ;;  %p437_p12 = scmp.lt.s32.totalorder %s431_s9, %s431_s9 }
  0x3d   :  { %v80_v21 = vmax.f32 %v78_v11, %v79_v16  ;;  %346 = vmatprep.subr.bf16.mxu1 %v464_v0 }
  0x3e   :  { %342 = vmatpush3.bf16.msra.mxu0 %v341_v14  ;;  %v74_v25 = vrot.slane %v73_v20, 2  ;;  %p438_p13 = por %p437_p12, %p436_p11 }
  0x3f   :  { %v81_v26 = vrot.slane %v80_v21, 2  ;;  %v85_v34 = vld [vmem:[#allocation2] sm:$0x3] }
  0x40   :  { %v75_v27 = vmax.f32 %v73_v20, %v74_v25  ;;  %348 = vmatpush3.bf16.msra.mxu1 %v347_v22  ;;  %p439_p0 = pnand %p438_p13, %p432_p10 }
  0x41   :  { %v82_v28 = vmax.f32 %v80_v21, %v81_v26  ;;  %349 = vmatprep.subr.bf16.mxu1 %v464_v0 }
  0x42   :  { %v76_v30 = vrot.slane %v75_v27, 1 }
  0x43   :  { %v83_v31 = vrot.slane %v82_v28, 1 }
  0x44   :  { %v77_v32 = vmax.f32 %v75_v27, %v76_v30  ;;  %351 = vmatpush3.bf16.msra.mxu1 %v350_v29 }
  0x45   :  { %v84_v33 = vmax.f32 %v82_v28, %v83_v31  ;;  %352 = vmatprep.subr.bf16.mxu1 %v464_v0 }
  0x47   :  { %v89_v35 = vsel %vm88_vm3, %v84_v33, %v77_v32 }
  0x48   :  { %v91_v36 = vmax.f32 %v85_v34, %v89_v35  ;;  %354 = vmatpush3.bf16.msra.mxu1 %v353_v40 }
  0x4a   :  { %93 = vst.msk [vmem:[#allocation2] sm:$0x3] %vm66_vm0, %v91_v36 }
  0x51   :  { %v97_v37 = vld [vmem:[#allocation2] sm:$0x3] }
  0x52   :  { %316 = vmatmul.mubr.msk.f32.vlgmr.msra.gmra.mrb[0].mxu0 %vm70_vm2, %v97_v37 }
 0x125   :  { %v178_v42 = vpop.f32.mrb[0].mxu0 }
 0x126   :  { %v179_v43 = vadd.f32 %v289_v41, %v178_v42  ;;  %v317_v44 = vpop.f32.mrb[1].mxu0 }
 0x128   :  { %v182_v45 = vmax.f32 %v179_v43, 0.0 }
 0x12a   :  { %335 = vmatmul.mubr.msk.f32.vlgmr.msra.gmra.mrb[0].mxu1 %vm198_vm4, %v182_v45 }
 0x1fd   :  { %v268_v47 = vpop.f32.mrb[0].mxu1 }
 0x1fe   :  { %v269_v48 = vadd.f32 %v291_v46, %v268_v47  ;;  %v336_v49 = vpop.f32.mrb[1].mxu1 }
 0x200   :  { %272 = vst [vmem:[#allocation9] sm:$0x3] %v269_v48 }
 0x201   :  { %442 = shalt.err (!%p439_p0)
}
 0x202   :  { %s443_s11 = scalar_lea.hbm %s579_s5, 32 }
 0x203   :  { %p444_p1 = scmp.ne.s32.totalorder %s579_s5, %s443_s11  ;;  %p447_p2 = scmp.lt.u32.totalorder %s443_s11, %s579_s5 }
 0x205   :  { %p449_p3 = pnand %p447_p2, %p444_p1 }
 0x207   :  { %452 = shalt.err (!%p449_p3)
}
 0x208   :  { %282 = dma.vmem_to_hbm [thread:$0]  %s280_s8, 32, %s579_s5, [#allocation5]  }
 0x209   :  { %457 = dma.done.wait [#allocation5], 32  }
 0x20a   :  { %458 = vsyncadd [#allocation5], 4294967264 }
 0x20b   :  { %286 = vsyncpa [#allocation4], 1 }
 0x20c   :  { %287 = vsyncpa [#allocation7], 1 }
 0x20d   :  { %288 = vsyncpa [#allocation5], 1 }

</bundles_post_ra>
